<compile_context>
chip_gen: v7x
topology: tpu7x:2x2x1
jax: 0.10.0
libtpu: 0.0.40
codegen_flags: <defaults>
</compile_context>

<pallas_src>
import math

import jax
import jax.numpy as jnp
from jax.experimental import pallas as pl
from jax.experimental.pallas import tpu as pltpu


def _token_embedding_kernel(x_ref, w_ref, o_ref):
    # x_ref: (1, L, c_in)   input slab for this batch element
    # w_ref: (3, c_in, TD)  conv taps, pre-transposed to matmul layout
    # o_ref: (1, L, TD)     output tile
    x = x_ref[0]                                    # (L, c_in), f32
    # circular kernel_size=3 neighbourhood: row l sees rows l-1, l, l+1 (mod L)
    x_prev = jnp.roll(x, shift=1, axis=0)           # row l holds x[(l-1) % L]
    x_next = jnp.roll(x, shift=-1, axis=0)          # row l holds x[(l+1) % L]

    acc = jnp.dot(x_prev, w_ref[0], preferred_element_type=jnp.float32)
    acc = acc + jnp.dot(x, w_ref[1], preferred_element_type=jnp.float32)
    acc = acc + jnp.dot(x_next, w_ref[2], preferred_element_type=jnp.float32)
    o_ref[0] = acc.astype(o_ref.dtype)


def _pick_tile_d(L, d_model, budget_bytes=4 << 20):
    """Largest output-channel tile that divides d_model, stays a multiple of
    128 (lane-dense, unmasked stores) and keeps the (L, tile_d) f32 output
    buffer under the VMEM budget (pipeline double-buffers it; v7x = 64 MiB)."""
    if d_model % 128 != 0:
        return d_model          # small / unaligned d_model: one lane-padded tile
    tile_d = d_model
    while L * tile_d * 4 > budget_bytes and tile_d % 256 == 0:
        tile_d //= 2            # halving a divisor of d_model keeps divisibility
    return tile_d


def token_embedding(x, weight, *, tile_d=None):
    """x: (B, L, c_in) float32; weight: (d_model, c_in, 3) (PyTorch Conv1d layout).
    Returns (B, L, d_model), matching TokenEmbedding.forward."""
    B, L, c_in = x.shape
    d_model, c_in_w, ksize = weight.shape
    assert c_in_w == c_in and ksize == 3, "weight must be (d_model, c_in, 3)"

    if tile_d is None:
        tile_d = _pick_tile_d(L, d_model)
    assert d_model % tile_d == 0
    n_d = d_model // tile_d

    # (d_model, c_in, 3) -> (3, c_in, d_model): tap k becomes a (c_in, d_model)
    # right-hand matmul operand (host-side layout plumbing, done once).
    w = jnp.transpose(weight, (2, 1, 0)).astype(jnp.float32)

    cost = pl.CostEstimate(
        flops=2 * 3 * B * L * c_in * d_model,
        transcendentals=0,
        bytes_accessed=4 * (B * n_d * L * c_in        # x slab per grid step
                            + B * 3 * c_in * d_model  # weights per grid step
                            + B * L * d_model),       # output
    )

    return pl.pallas_call(
        _token_embedding_kernel,
        out_shape=jax.ShapeDtypeStruct((B, L, d_model), x.dtype),
        grid_spec=pltpu.PrefetchScalarGridSpec(
            num_scalar_prefetch=0,
            grid=(B, n_d),
            in_specs=[
                pl.BlockSpec((1, L, c_in), lambda b, j: (b, 0, 0)),
                pl.BlockSpec((3, c_in, tile_d), lambda b, j: (0, 0, j)),
            ],
            out_specs=pl.BlockSpec((1, L, tile_d), lambda b, j: (b, 0, j)),
        ),
        compiler_params=pltpu.CompilerParams(
            dimension_semantics=("parallel", "parallel"),
        ),
        cost_estimate=cost,
    )(x, w)


def _reference(x, weight):
    """Pure-JAX reference: circular-padded conv1d, independent formulation."""
    x_t = jnp.transpose(x, (0, 2, 1))                                   # (B, c_in, L)
    x_pad = jnp.concatenate([x_t[..., -1:], x_t, x_t[..., :1]], axis=-1)  # circular pad 1
    y = jax.lax.conv_general_dilated(
        x_pad, weight, window_strides=(1,), padding="VALID",
        dimension_numbers=("NCH", "OIH", "NCH"))                        # (B, d_model, L)
    return jnp.transpose(y, (0, 2, 1))                                  # (B, L, d_model)


if __name__ == "__main__":
    key = jax.random.PRNGKey(0)
    B, L, c_in, d_model = 2, 8, 4, 32
    kx, kw = jax.random.split(key)

    x = jax.random.normal(kx, (B, L, c_in), dtype=jnp.float32)
    # kaiming_normal_(mode='fan_in', nonlinearity='leaky_relu') equivalent
    fan_in = c_in * 3
    gain = math.sqrt(2.0 / (1.0 + 0.01 ** 2))
    weight = (gain / math.sqrt(fan_in)) * jax.random.normal(
        kw, (d_model, c_in, 3), dtype=jnp.float32)

    out = token_embedding(x, weight)
    out = jax.block_until_ready(out)

    ref = _reference(x, weight)
    assert out.shape == (B, L, d_model)
    err = float(jnp.max(jnp.abs(out - ref)))
    assert jnp.allclose(out, ref, atol=1e-4, rtol=1e-4), f"max abs err {err}"

    print("KERNEL_OK")
</pallas_src>

<mosaic_0001>
module attributes {stable_mosaic.version = 11 : i64} {
  func.func @_token_embedding_kernel(%arg0: i32, %arg1: i32, %arg2: memref<1x8x4xf32, #tpu.memory_space<vmem>>, %arg3: memref<3x4x32xf32, #tpu.memory_space<vmem>>, %arg4: memref<1x8x32xf32, #tpu.memory_space<vmem>>) attributes {dimension_semantics = [#tpu.dimension_semantics<parallel>, #tpu.dimension_semantics<parallel>], iteration_bounds = array<i64: 2, 1>, scalar_prefetch = 0 : i64, scratch_operands = 0 : i64, tpu.core_type = #tpu.core_type<tc>, window_params = [{transform_indices = @transform_0, window_bounds = array<i64: 1, 8, 4>}, {transform_indices = @transform_1, window_bounds = array<i64: 3, 4, 32>}, {transform_indices = @transform_2, window_bounds = array<i64: 1, 8, 32>}]} {
    %c0 = arith.constant 0 : index
    %c0_0 = arith.constant 0 : index
    %c0_1 = arith.constant 0 : index
    %0 = vector.load %arg2[%c0, %c0_0, %c0_1] : memref<1x8x4xf32, #tpu.memory_space<vmem>>, vector<1x8x4xf32>
    %1 = vector.shape_cast %0 : vector<1x8x4xf32> to vector<8x4xf32>
    %2 = vector.extract_strided_slice %1 {offsets = [7, 0], sizes = [1, 4], strides = [1, 1]} : vector<8x4xf32> to vector<1x4xf32>
    %3 = vector.extract_strided_slice %1 {offsets = [0, 0], sizes = [7, 4], strides = [1, 1]} : vector<8x4xf32> to vector<7x4xf32>
    %4 = tpu.concatenate %2, %3 in 0 : vector<1x4xf32>, vector<7x4xf32> -> vector<8x4xf32>
    %5 = vector.extract_strided_slice %1 {offsets = [1, 0], sizes = [7, 4], strides = [1, 1]} : vector<8x4xf32> to vector<7x4xf32>
    %6 = vector.extract_strided_slice %1 {offsets = [0, 0], sizes = [1, 4], strides = [1, 1]} : vector<8x4xf32> to vector<1x4xf32>
    %7 = tpu.concatenate %5, %6 in 0 : vector<7x4xf32>, vector<1x4xf32> -> vector<8x4xf32>
    %c0_2 = arith.constant 0 : index
    %c0_3 = arith.constant 0 : index
    %c0_4 = arith.constant 0 : index
    %8 = vector.load %arg3[%c0_2, %c0_3, %c0_4] : memref<3x4x32xf32, #tpu.memory_space<vmem>>, vector<1x4x32xf32>
    %9 = vector.shape_cast %8 : vector<1x4x32xf32> to vector<4x32xf32>
    %cst = arith.constant dense<0.000000e+00> : vector<8x32xf32>
    %10 = tpu.matmul %4, %9, %cst {dimension_numbers = #tpu.dot_dimension_numbers<[1], [0], [0], [1], [0, 0, 1, 1], [], []>} : vector<8x4xf32>, vector<4x32xf32>, vector<8x32xf32> -> vector<8x32xf32>
    %c1 = arith.constant 1 : index
    %c0_5 = arith.constant 0 : index
    %c0_6 = arith.constant 0 : index
    %11 = vector.load %arg3[%c1, %c0_5, %c0_6] : memref<3x4x32xf32, #tpu.memory_space<vmem>>, vector<1x4x32xf32>
    %12 = vector.shape_cast %11 : vector<1x4x32xf32> to vector<4x32xf32>
    %cst_7 = arith.constant dense<0.000000e+00> : vector<8x32xf32>
    %13 = tpu.matmul %1, %12, %cst_7 {dimension_numbers = #tpu.dot_dimension_numbers<[1], [0], [0], [1], [0, 0, 1, 1], [], []>} : vector<8x4xf32>, vector<4x32xf32>, vector<8x32xf32> -> vector<8x32xf32>
    %14 = arith.addf %10, %13 : vector<8x32xf32>
    %c2 = arith.constant 2 : index
    %c0_8 = arith.constant 0 : index
    %c0_9 = arith.constant 0 : index
    %15 = vector.load %arg3[%c2, %c0_8, %c0_9] : memref<3x4x32xf32, #tpu.memory_space<vmem>>, vector<1x4x32xf32>
    %16 = vector.shape_cast %15 : vector<1x4x32xf32> to vector<4x32xf32>
    %cst_10 = arith.constant dense<0.000000e+00> : vector<8x32xf32>
    %17 = tpu.matmul %7, %16, %cst_10 {dimension_numbers = #tpu.dot_dimension_numbers<[1], [0], [0], [1], [0, 0, 1, 1], [], []>} : vector<8x4xf32>, vector<4x32xf32>, vector<8x32xf32> -> vector<8x32xf32>
    %18 = arith.addf %14, %17 : vector<8x32xf32>
    %c0_11 = arith.constant 0 : index
    %c0_12 = arith.constant 0 : index
    %c0_13 = arith.constant 0 : index
    %19 = vector.load %arg4[%c0_11, %c0_12, %c0_13] : memref<1x8x32xf32, #tpu.memory_space<vmem>>, vector<1x8x32xf32>
    %20 = vector.shape_cast %19 : vector<1x8x32xf32> to vector<8x32xf32>
    %21 = vector.shape_cast %18 : vector<8x32xf32> to vector<1x8x32xf32>
    tpu.vector_store %arg4[%c0_11, %c0_12, %c0_13], %21 {strides = array<i32>} : memref<1x8x32xf32, #tpu.memory_space<vmem>>, vector<1x8x32xf32>,
    return
  }
  func.func @transform_0(%arg0: i32, %arg1: i32) -> (i32, i32, i32) {
    %c0_i32 = arith.constant 0 : i32
    %c0_i32_0 = arith.constant 0 : i32
    %c0_i32_1 = arith.constant 0 : i32
    return %arg0, %c0_i32, %c0_i32_0 : i32, i32, i32
  }
  func.func @transform_1(%arg0: i32, %arg1: i32) -> (i32, i32, i32) {
    %c0_i32 = arith.constant 0 : i32
    %c0_i32_0 = arith.constant 0 : i32
    %c0_i32_1 = arith.constant 0 : i32
    return %c0_i32, %c0_i32_0, %arg1 : i32, i32, i32
  }
  func.func @transform_2(%arg0: i32, %arg1: i32) -> (i32, i32, i32) {
    %c0_i32 = arith.constant 0 : i32
    %c0_i32_0 = arith.constant 0 : i32
    return %arg0, %c0_i32, %arg1 : i32, i32, i32
  }
}

</mosaic_0001>

<bundles_post_ra>
// kernel: tpu_custom_call.1
= control target key start
LH: loop header
LB: loop body
LE: loop exit
PB: predicated region body
PF: predicated region fallthrough
CT: control target
= control target key end

     0   :  { %7 = vsyncpa [#allocation3], 0  ;;  %s841_s0 = inlined_call_operand.vmem [shape: f32[2,8,4], index: 0, kind: input, shape index: {}]   ;;  %s842_s1 = inlined_call_operand.vmem [shape: f32[3,4,32], index: 1, kind: input, shape index: {}]   ;;  %s843_s2 = inlined_call_operand.hbm [shape: f32[2,8,32], index: 2, kind: output, shape index: {}]  }
   0x1   :  { %9 = vsyncpa [#allocation3 + $0x1], 0  ;;  %s714_s9 = smov 0   ;;  %s716_s10 = smov 0  }
   0x2   :  { %s718_s11 = smov 0   ;;  %s720_s12 = smov 0  }
   0x3   :  { %s722_s13 = smov 0   ;;  %s724_s14 = smov 0  }
   0x4 LB: > { %s515_s15 = sadd.s32 4294967295, %s694_s14   ;;  %s516_s16 = sadd.s32 4294967294, %s694_s14   ;;  %s694_s14 = sphi %s724_s14, %s15_s14   ;;  %s690_s13 = sphi %s722_s13, %s850_s13   ;;  %s686_s12 = sphi %s720_s12, %s849_s12   ;;  %s682_s11 = sphi %s718_s11, %s848_s11   ;;  %s678_s10 = sphi %s716_s10, %s847_s10   ;;  %s674_s9 = sphi %s714_s9, %s846_s9  }
   0x5   : > { %s27_s17 = sadd.s32 1, %s690_s13  ;;  %s88_s18 = sadd.s32 1, %s682_s11 }
   0x6   : > { %p29_p0 = scmp.ge.s32.totalorder %s27_s17, 2  ;;  %p98_p1 = scmp.ne.s32.totalorder %s682_s11, %s678_s10 }
   0x7   : > { %p99_p2 = scmp.eq.s32.totalorder %s515_s15, 1  ;;  %p104_p3 = scmp.ne.s32.totalorder %s678_s10, %s674_s9 }
   0x8   : > { %s852_s17 = smov (%p29_p0, %s27_s17), 0  ;;  %p105_p5 = scmp.eq.s32.totalorder %s516_s16, 1 }
   0x9   : > { %p754_p4 = por %p99_p2, %p98_p1  ;;  %s83_s20 = ssub.s32 %s690_s13, %s852_s17 }
   0xa   : > { %p520_p6 = scmp.ge.s32.totalorder %s694_s14, 1  ;;  %p86_p7 = scmp.eq.s32.totalorder %s83_s20, 0 }
   0xb   : > { %p761_p8 = por %p105_p5, %p104_p3  ;;  %p137_p9 = scmp.lt.s32.totalorder %s694_s14, 3 }
   0xc   : > { %s767_s22 = scalar_select %p86_p7, %s682_s11, %s88_s18  }
   0xd   : > { %p138_p10 = pnand %p520_p6, %p137_p9 }
   0xe   : > { %v180_v0 = vld [vmem:[%s842_s1] sm:$0xf] (!%p138_p10)  ;;  %vm186_vm0 = vcmask (!%p138_p10), 1043456   ;;  %p162_p11 = scmp.lt.s32.totalorder (!%p138_p10), %s686_s12, 1  ;;  %v696_v1 = vmov (!%p138_p10), 0.0   ;;  %vm697_vm1 = vmmov (!%p138_p10), 0  }
   0xf   : > { %141 = sbr.rel (%p138_p10) target bundleno = 265 (0x109), region = 28  ;;  %546 = vmatprep.subr.mxu0 (!%p138_p10), %v696_v1  ;;  %548 = vmatprep.mubr.msk.f32.mxu0 (!%p138_p10), %vm697_vm1, %v696_v1  ;;  %v523_v2 = vld [vmem:[%s842_s1 + $0x4] sm:$0xf] (!%p138_p10)  ;;  %vm183_vm2 = vcmask (!%p138_p10), 31744   ;;  %v528_v5 = vld [vmem:[%s842_s1 + $0x8] sm:$0xf] (!%p138_p10) }
  0x10   : > { %547 = vmatpush3.msk.msra.mxu0 (!%p138_p10), %vm186_vm0, %v180_v0  ;;  %541 = vmatprep.subr.mxu1 (!%p138_p10), %v696_v1  ;;  %s159_s6 = sand.u32 (!%p138_p10), 1, %s678_s10   ;;  %s532_s8 = sshll.u32 (!%p138_p10), %s686_s12, 7  ;;  %vm415_vm3 = vcmask (!%p138_p10), 261120  }
  0x11   : > { %551 = vmatprep.subr.mxu0 (!%p138_p10), %v696_v1  ;;  %542 = vmatpush3.msk.msra.mxu1 (!%p138_p10), %vm186_vm0, %v523_v2  ;;  %s521_s7 = sshll.u32 (!%p138_p10), %s159_s6, 3  ;;  %s794_s23 = scalar_lea.hbm (!%p138_p10), %s843_s2, %s532_s8 }
  0x12   : > { %543 = vmatprep.mubr.msk.f32.mxu1 (!%p138_p10), %vm697_vm1, %v696_v1  ;;  %s161_s15 = scalar_lea.vmem (!%p138_p10), [#allocation2], %s521_s7  ;;  %s418_s24 = scalar_lea.sflag (!%p138_p10), [#allocation3], %s159_s6 }
  0x13   : > { %s432_s16 = sshll.u32 (!%p138_p10), %s161_s15, 4  ;;  %s796_s16 = int_to_ptr.vmem [resolvable:$true] %s432_s16 }
  0x14   : > { %s616_s25 = scalar_lea.vmem (!%p138_p10), %s796_s16, 128 }
  0x15   : > { %p617_p12 = scmp.ne.s32.totalorder (!%p138_p10), %s796_s16, %s616_s25 }
  0x16   : > { %s163_s27 = scalar_select %p162_p11, %s686_s12, 1 }
  0x17   : > { %p618_p13 = pnand %p617_p12, %p754_p4  ;;  %s698_s12 = smov [#allocation2]  }
  0x18   : > { %s522_s28 = sshll.u32 %s163_s27, 3  ;;  %s620_s26 = sshll.u32 %s698_s12, 4  ;;  %s621_s26 = int_to_ptr.vmem [resolvable:$false] %s620_s26 }
  0x19   : > { %s165_s3 = scalar_lea.vmem %s841_s0, %s522_s28  ;;  %p619_p0 = pneg %p618_p13 }
  0x1a   : > { %v170_v3 = vld [vmem:[%s165_s3] sm:$0xff]  ;;  %s622_s27 = scalar_lea.vmem %s621_s26, 256  ;;  %p623_p1 = scmp.lt.s32.totalorder %s796_s16, %s621_s26 }
  0x1b   : > { %v172_v4 = vrot.slane %v170_v3, 7  ;;  %544 = vmatmul.mubr.msk.f32.vlgmr.msra.gmra.mrb[0].mxu1 %vm183_vm2, %v170_v3  ;;  %v176_v6 = vrot.slane %v170_v3, 1  ;;  %p624_p2 = scmp.lt.s32.totalorder %s622_s27, %s616_s25 }
  0x1d   : > { %549 = vmatmul.mubr.msk.f32.vlgmr.msra.gmra.mrb[0].mxu0 %vm183_vm2, %v172_v4  ;;  %p625_p3 = por %p624_p2, %p623_p1 }
  0x1e   : > { %552 = vmatpush3.msk.msra.mxu0 %vm186_vm0, %v528_v5  ;;  %553 = vmatprep.mubr.msk.f32.mxu0 %vm697_vm1, %v696_v1 }
  0x1f   : > { %p626_p5 = pnand %p625_p3, %p619_p0 }
  0x25   : > { %554 = vmatmul.mubr.msk.f32.vlgmr.msra.gmra.mrb[0].mxu0 %vm183_vm2, %v176_v6 }
  0xee   : > { %v256_v7 = vpop.f32.mrb[0].mxu1 }
  0xef   : > { %v545_v8 = vpop.f32.mrb[1].mxu1 }
  0xf8   : > { %v410_v9 = vpop.f32.mrb[0].mxu0 }
  0xf9   : > { %v556_v10 = vadd.f32 %v410_v9, %v256_v7  ;;  %v555_v11 = vpop.f32.mrb[1].mxu0 }
  0xfb   : > { %416 = vst.msk [vmem:[%s161_s15] sm:$0xff] %vm415_vm3, %v556_v10 }
  0xfc   : > { %629 = shalt.err (!%p626_p5)
}
  0xfd   : > { %s630_s28 = scalar_lea.hbm %s794_s23, 128  ;;  %s634_s3 = scalar_lea.hbm %s843_s2, 256 }
  0xfe   : > { %p631_p6 = scmp.ne.s32.totalorder %s794_s23, %s630_s28  ;;  %p635_p10 = scmp.lt.u32.totalorder %s794_s23, %s843_s2 }
  0xff   : > { %p636_p11 = scmp.lt.u32.totalorder %s634_s3, %s630_s28  ;;  %p638_p13 = scmp.lt.u32.totalorder %s630_s28, %s794_s23 }
 0x100   : > { %p632_p7 = pnand %p631_p6, %p754_p4 }
 0x101   : > { %p637_p12 = por %p636_p11, %p635_p10 }
 0x102   : > { %p633_p9 = pneg %p632_p7 }
 0x103   : > { %p639_p0 = por %p638_p13, %p637_p12 }
 0x105   : > { %p640_p1 = pnand %p639_p0, %p633_p9 }
 0x107   : > { %643 = shalt.err (!%p640_p1)
}
 0x108   : > { %559 = dma.vmem_to_hbm [thread:$0]  (%p754_p4), %s796_s16, 128, %s794_s23, %s418_s24  }
 0x109 PF: > { %p565_p2 = scmp.ge.s32.totalorder %s694_s14, 2  ;;  %s444_s6 = sand.u32 1, %s674_s9  }
 0x10a   : > { %s445_s7 = scalar_lea.sflag [#allocation3], %s444_s6 }
 0x10b   : > { %p562_p3 = pnand %p565_p2, %p761_p8 }
 0x10d   : > { %669 = dma.done.wait (!%p562_p3), %s445_s7, 128  }
 0x10e   : > { %671 = vsyncadd (!%p562_p3), %s445_s7, 4294967168  ;;  %s15_s14 = sadd.s32 1, %s694_s14   ;;  %s846_s9 = smov %s678_s10 }
 0x10f   : > { %p12_p5 = scmp.ge.s32.totalorder %s15_s14, 4   ;;  %s847_s10 = smov %s682_s11 }
 0x110   : > { %s848_s11 = smov %s767_s22  ;;  %s849_s12 = smov %s690_s13 }
 0x111   : > { %s850_s13 = smov %s852_s17  ;;  %14 = sbr.rel (!%p12_p5) target bundleno = 4 (0x4), region = 68 }
 0x118   :  { %450 = vsyncpa [#allocation3], 1 }
 0x119   :  { %452 = vsyncpa [#allocation3 + $0x1], 1 }

</bundles_post_ra>
